<compile_context>
chip_gen: v5e
topology: v5e:2x2
jax: 0.10.0
libtpu: 0.0.40
codegen_flags: <defaults>
</compile_context>

<pallas_src>
import jax
import jax.numpy as jnp
from jax.experimental import pallas as pl
from jax.experimental.pallas import tpu as pltpu

ALPHA = 0.25
GAMMA = 2.0
EPS = 1e-8


def _focal_loss_kernel(out_ref, tgt_ref, part_ref, acc_ref):
    step = pl.program_id(1)

    @pl.when(step == 0)
    def _init():
        acc_ref[...] = jnp.zeros_like(acc_ref)

    o = out_ref[...].astype(jnp.float32)
    t = tgt_ref[...].astype(jnp.float32)
    one_minus_t = 1.0 - t
    one_minus_o = 1.0 - o

    # pt = t*o + (1-t)*(1-o);  focal = -alpha * (1-pt)^gamma * ce
    pt = t * o + one_minus_t * one_minus_o
    one_minus_pt = 1.0 - pt
    if GAMMA == 2.0:
        focal_w = one_minus_pt * one_minus_pt        # avoid transcendental pow
    else:
        focal_w = one_minus_pt ** GAMMA
    ce = t * jnp.log(o + EPS) + one_minus_t * jnp.log(one_minus_o + EPS)

    # Pure VPU elementwise accumulate (no per-step cross-lane reduce);
    # the constant -ALPHA is applied once to the final partial sum.
    acc_ref[...] += focal_w * ce

    @pl.when(step == pl.num_programs(1) - 1)
    def _finalize():
        partial = -ALPHA * jnp.sum(acc_ref[...])
        part_ref[...] = jnp.broadcast_to(partial, part_ref.shape).astype(jnp.float32)


def _pick_tile_rows(B, L, itemsize, tile_rows=None, vmem_budget=24 * 1024 * 1024):
    """Largest multiple-of-8 row tile that divides B and fits the VMEM budget."""
    if tile_rows is not None:
        assert B % tile_rows == 0, "batch must be divisible by tile_rows"
        assert tile_rows % 8 == 0 or tile_rows == B
        return tile_rows
    # Steady-state footprint ~ 2 inputs x 2 pipeline buffers + f32 accumulator.
    # TODO(synk): for very large label counts (L >~ 4096) add a second grid
    # axis over L instead of loading full rows.
    bytes_per_row = L * (4 * itemsize + 4)
    max_rows = max(8, vmem_budget // bytes_per_row)
    max_rows = min(2048, (max_rows // 8) * 8)
    cand = min(max_rows, (B // 8) * 8)
    while cand >= 8 and B % cand != 0:
        cand -= 8
    return cand if cand >= 8 else B  # fall back to one full-array block


def multilabel_focal_loss(outputs, targets, *, tile_rows=None):
    assert outputs.shape == targets.shape
    assert outputs.ndim == 2
    B, L = outputs.shape
    itemsize = jnp.dtype(outputs.dtype).itemsize

    tile_rows = _pick_tile_rows(B, L, itemsize, tile_rows)
    n_tiles = B // tile_rows
    n_par = 2 if (n_tiles >= 2 and n_tiles % 2 == 0) else 1
    n_steps = n_tiles // n_par

    # VMEM budget: 2 inputs x 2 pipeline buffers + f32 accumulator + slack.
    tile_in_bytes = tile_rows * L * itemsize
    tile_acc_bytes = tile_rows * L * 4
    vmem_limit = 4 * tile_in_bytes + tile_acc_bytes + (2 << 20)
    vmem_limit = int(min(max(vmem_limit, 32 << 20), 48 << 20))

    in_spec = pl.BlockSpec((tile_rows, L), lambda p, i: (p * n_steps + i, 0))

    partials = pl.pallas_call(
        _focal_loss_kernel,
        out_shape=jax.ShapeDtypeStruct((n_par, 8, 128), jnp.float32),
        grid_spec=pltpu.PrefetchScalarGridSpec(
            num_scalar_prefetch=0,
            grid=(n_par, n_steps),
            in_specs=[in_spec, in_spec],
            out_specs=pl.BlockSpec((1, 8, 128), lambda p, i: (p, 0, 0)),
            scratch_shapes=[pltpu.VMEM((tile_rows, L), jnp.float32)],
        ),
        compiler_params=pltpu.CompilerParams(
            dimension_semantics=("parallel", "arbitrary"),
            vmem_limit_bytes=vmem_limit,
        ),
    )(outputs, targets)

    total = jnp.float32(B * L)
    return jnp.sum(partials[:, 0, 0]) / total


def _reference_focal_loss(outputs, targets):
    pt = targets * outputs + (1.0 - targets) * (1.0 - outputs)
    fl = -ALPHA * (1.0 - pt) ** GAMMA * (
        targets * jnp.log(outputs + EPS)
        + (1.0 - targets) * jnp.log(1.0 - outputs + EPS)
    )
    return fl.mean()


if __name__ == "__main__":
    key = jax.random.PRNGKey(0)
    k1, k2 = jax.random.split(key)

    B, L = 64, 128  # small multi-label classification problem
    logits = jax.random.normal(k1, (B, L), dtype=jnp.float32)
    outputs = jax.nn.sigmoid(logits)                       # probabilities in (0, 1)
    targets = jax.random.bernoulli(k2, 0.3, (B, L)).astype(jnp.float32)

    # tile_rows=16 -> 4 row tiles -> grid (parallel=2, steps=2) even at demo size.
    loss = jax.block_until_ready(
        multilabel_focal_loss(outputs, targets, tile_rows=16))
    ref = jax.block_until_ready(_reference_focal_loss(outputs, targets))

    assert jnp.allclose(loss, ref, rtol=1e-5, atol=1e-6), (loss, ref)

    # Also exercise the auto-tiling path (single big tile at this size).
    loss_auto = jax.block_until_ready(multilabel_focal_loss(outputs, targets))
    assert jnp.allclose(loss_auto, ref, rtol=1e-5, atol=1e-6), (loss_auto, ref)

    print("KERNEL_OK")
</pallas_src>

<mosaic_0001>
module attributes {stable_mosaic.version = 11 : i64} {
  func.func @_focal_loss_kernel(%arg0: i32, %arg1: i32, %arg2: memref<16x128xf32, #tpu.memory_space<vmem>>, %arg3: memref<16x128xf32, #tpu.memory_space<vmem>>, %arg4: memref<1x8x128xf32, #tpu.memory_space<vmem>>, %arg5: memref<16x128xf32, #tpu.memory_space<vmem>>) attributes {dimension_semantics = [#tpu.dimension_semantics<parallel>, #tpu.dimension_semantics<arbitrary>], iteration_bounds = array<i64: 2, 2>, scalar_prefetch = 0 : i64, scratch_operands = 1 : i64, tpu.core_type = #tpu.core_type<tc>, window_params = [{transform_indices = @transform_0, window_bounds = array<i64: 16, 128>}, {transform_indices = @transform_1, window_bounds = array<i64: 16, 128>}, {transform_indices = @transform_2, window_bounds = array<i64: 1, 8, 128>}]} {
    %c0_i32 = arith.constant 0 : i32
    %0 = arith.cmpi eq, %arg1, %c0_i32 : i32
    %1 = arith.extui %0 : i1 to i32
    %c0_i32_0 = arith.constant 0 : i32
    %2 = arith.cmpi ne, %1, %c0_i32_0 : i32
    scf.if %2 {
      %cst_13 = arith.constant 0.000000e+00 : f32
      %31 = vector.broadcast %cst_13 : f32 to vector<16x128xf32>
      %c0_14 = arith.constant 0 : index
      %c0_15 = arith.constant 0 : index
      %32 = vector.load %arg5[%c0_14, %c0_15] : memref<16x128xf32, #tpu.memory_space<vmem>>, vector<16x128xf32>
      tpu.vector_store %arg5[%c0_14, %c0_15], %31 {strides = array<i32>} : memref<16x128xf32, #tpu.memory_space<vmem>>, vector<16x128xf32>,
    } else {
    }
    %c0 = arith.constant 0 : index
    %c0_1 = arith.constant 0 : index
    %3 = vector.load %arg2[%c0, %c0_1] : memref<16x128xf32, #tpu.memory_space<vmem>>, vector<16x128xf32>
    %c0_2 = arith.constant 0 : index
    %c0_3 = arith.constant 0 : index
    %4 = vector.load %arg3[%c0_2, %c0_3] : memref<16x128xf32, #tpu.memory_space<vmem>>, vector<16x128xf32>
    %cst = arith.constant 1.000000e+00 : f32
    %5 = vector.broadcast %cst : f32 to vector<16x128xf32>
    %6 = arith.subf %5, %4 : vector<16x128xf32>
    %cst_4 = arith.constant 1.000000e+00 : f32
    %7 = vector.broadcast %cst_4 : f32 to vector<16x128xf32>
    %8 = arith.subf %7, %3 : vector<16x128xf32>
    %9 = arith.mulf %4, %3 : vector<16x128xf32>
    %10 = arith.mulf %6, %8 : vector<16x128xf32>
    %11 = arith.addf %9, %10 : vector<16x128xf32>
    %cst_5 = arith.constant 1.000000e+00 : f32
    %12 = vector.broadcast %cst_5 : f32 to vector<16x128xf32>
    %13 = arith.subf %12, %11 : vector<16x128xf32>
    %14 = arith.mulf %13, %13 : vector<16x128xf32>
    %cst_6 = arith.constant 9.99999993E-9 : f32
    %15 = vector.broadcast %cst_6 : f32 to vector<16x128xf32>
    %16 = arith.addf %3, %15 : vector<16x128xf32>
    %17 = math.log %16 : vector<16x128xf32>
    %18 = arith.mulf %4, %17 : vector<16x128xf32>
    %cst_7 = arith.constant 9.99999993E-9 : f32
    %19 = vector.broadcast %cst_7 : f32 to vector<16x128xf32>
    %20 = arith.addf %8, %19 : vector<16x128xf32>
    %21 = math.log %20 : vector<16x128xf32>
    %22 = arith.mulf %6, %21 : vector<16x128xf32>
    %23 = arith.addf %18, %22 : vector<16x128xf32>
    %c0_8 = arith.constant 0 : index
    %c0_9 = arith.constant 0 : index
    %24 = vector.load %arg5[%c0_8, %c0_9] : memref<16x128xf32, #tpu.memory_space<vmem>>, vector<16x128xf32>
    %25 = arith.mulf %14, %23 : vector<16x128xf32>
    %26 = arith.addf %24, %25 : vector<16x128xf32>
    %c0_10 = arith.constant 0 : index
    %c0_11 = arith.constant 0 : index
    %27 = vector.load %arg5[%c0_10, %c0_11] : memref<16x128xf32, #tpu.memory_space<vmem>>, vector<16x128xf32>
    tpu.vector_store %arg5[%c0_10, %c0_11], %26 {strides = array<i32>} : memref<16x128xf32, #tpu.memory_space<vmem>>, vector<16x128xf32>,
    %c1_i32 = arith.constant 1 : i32
    %28 = arith.cmpi eq, %arg1, %c1_i32 : i32
    %29 = arith.extui %28 : i1 to i32
    %c0_i32_12 = arith.constant 0 : i32
    %30 = arith.cmpi ne, %29, %c0_i32_12 : i32
    scf.if %30 {
      %c0_13 = arith.constant 0 : index
      %c0_14 = arith.constant 0 : index
      %31 = vector.load %arg5[%c0_13, %c0_14] : memref<16x128xf32, #tpu.memory_space<vmem>>, vector<16x128xf32>
      %32 = vector.shape_cast %31 : vector<16x128xf32> to vector<1x16x128xf32>
      %cst_15 = arith.constant dense<0.000000e+00> : vector<1xf32>
      %33 = vector.multi_reduction <add>, %32, %cst_15 [1, 2] : vector<1x16x128xf32> to vector<1xf32>
      %34 = vector.shape_cast %33 : vector<1xf32> to vector<1x1x1xf32>
      %35 = vector.extract %34[0, 0, 0] : f32 from vector<1x1x1xf32>
      %cst_16 = arith.constant -2.500000e-01 : f32
      %36 = arith.mulf %cst_16, %35 : f32
      %37 = vector.broadcast %36 : f32 to vector<1x8x128xf32>
      %c0_17 = arith.constant 0 : index
      %c0_18 = arith.constant 0 : index
      %c0_19 = arith.constant 0 : index
      %38 = vector.load %arg4[%c0_17, %c0_18, %c0_19] : memref<1x8x128xf32, #tpu.memory_space<vmem>>, vector<1x8x128xf32>
      tpu.vector_store %arg4[%c0_17, %c0_18, %c0_19], %37 {strides = array<i32>} : memref<1x8x128xf32, #tpu.memory_space<vmem>>, vector<1x8x128xf32>,
    } else {
    }
    return
  }
  func.func @transform_0(%arg0: i32, %arg1: i32) -> (i32, i32) {
    %c2_i32 = arith.constant 2 : i32
    %0 = arith.muli %arg0, %c2_i32 : i32
    %1 = arith.addi %0, %arg1 : i32
    %c0_i32 = arith.constant 0 : i32
    %c0_i32_0 = arith.constant 0 : i32
    return %1, %c0_i32 : i32, i32
  }
  func.func @transform_1(%arg0: i32, %arg1: i32) -> (i32, i32) {
    %c2_i32 = arith.constant 2 : i32
    %0 = arith.muli %arg0, %c2_i32 : i32
    %1 = arith.addi %0, %arg1 : i32
    %c0_i32 = arith.constant 0 : i32
    %c0_i32_0 = arith.constant 0 : i32
    return %1, %c0_i32 : i32, i32
  }
  func.func @transform_2(%arg0: i32, %arg1: i32) -> (i32, i32, i32) {
    %c0_i32 = arith.constant 0 : i32
    %c0_i32_0 = arith.constant 0 : i32
    %c0_i32_1 = arith.constant 0 : i32
    return %arg0, %c0_i32, %c0_i32_0 : i32, i32, i32
  }
}

</mosaic_0001>

<bundles_post_ra>
// kernel: tpu_custom_call.1
= control target key start
LH: loop header
LB: loop body
LE: loop exit
PB: predicated region body
PF: predicated region fallthrough
CT: control target
= control target key end

     0   :  { %s988_s0 = inlined_call_operand.hbm [shape: f32[64,128], index: 0, kind: input, shape index: {}]   ;;  %s989_s1 = inlined_call_operand.hbm [shape: f32[64,128], index: 1, kind: input, shape index: {}]   ;;  %s990_s2 = inlined_call_operand.hbm [shape: f32[2,8,128], index: 2, kind: output, shape index: {}]  }
   0x1   :  { %996 = sst [smem:[#allocation19_spill]] %s988_s0 }
   0x2   :  { %7 = vsyncpa [#allocation4], 0 }
   0x3   :  { %9 = vsyncpa [#allocation4 + $0x1], 0 }
   0x4   :  { %10 = vsyncpa [#allocation7], 0 }
   0x5   :  { %12 = vsyncpa [#allocation7 + $0x1], 0 }
   0x6   :  { %13 = vsyncpa [#allocation5], 0 }
   0x7   :  { %15 = vsyncpa [#allocation5 + $0x1], 0  ;;  %s783_s9 = smov 0   ;;  %s785_s10 = smov 0  }
   0x8   :  { %s787_s11 = smov 0   ;;  %s789_s12 = smov 0  }
   0x9   :  { %s791_s13 = smov 0   ;;  %s793_s14 = smov 0  }
   0xa   :  { %s795_s15 = smov 0   ;;  %s797_s16 = smov 0  }
   0xb   :  { %s799_s17 = smov 0   ;;  %s801_s18 = smov 0  }
   0xc   :  { %s803_s19 = smov 0  }
   0xd LB: > { %997 = sst [smem:[#allocation12_spill]] %s743_s14  ;;  %s429_s20 = sadd.s32 4294967295, %s763_s19   ;;  %s763_s19 = sphi %s803_s19, %s21_s19   ;;  %s759_s18 = sphi %s801_s18, %s1016_s18   ;;  %s755_s17 = sphi %s799_s17, %s1015_s17   ;;  %s751_s16 = sphi %s797_s16, %s1014_s16   ;;  %s747_s15 = sphi %s795_s15, %s1013_s15   ;;  %s743_s14 = sphi %s793_s14, %s1012_s14   ;;  %s739_s13 = sphi %s791_s13, %s1021_s13   ;;  %s735_s12 = sphi %s789_s12, %s1020_s12   ;;  %s731_s11 = sphi %s787_s11, %s1019_s11   ;;  %s727_s10 = sphi %s785_s10, %s1018_s10   ;;  %s723_s9 = sphi %s783_s9, %s1017_s9  }
   0xe   : > { %998 = sst [smem:[#allocation13_spill]] %s755_s17  ;;  %s430_s21 = sadd.s32 4294967294, %s763_s19  }
   0xf   : > { %999 = sst [smem:[#allocation14_spill]] %s759_s18  ;;  %s30_s22 = sadd.s32 1, %s755_s17 }
  0x10   : > { %s33_s23 = sadd.s32 1, %s759_s18  ;;  %p31_p0 = scmp.ge.s32.totalorder %s30_s22, 2 }
  0x11   : > { %s431_s24 = sshll.u32 %s759_s18, 1  ;;  %s44_s26 = sadd.s32 1, %s743_s14 }
  0x12   : > { %s842_s25 = sadd.s32 %s755_s17, %s431_s24  ;;  %s1023_s22 = smov (%p31_p0, %s30_s22), 0 }
  0x13   : > { %1000 = sst [smem:[#allocation15_spill]] %s1023_s22  ;;  %s1025_s23 = smov (!%p31_p0, %s33_s23), %s759_s18 }
  0x14   : > { %p51_p1 = scmp.ne.s32.totalorder %s743_s14, %s739_s13  ;;  %p52_p2 = scmp.eq.s32.totalorder %s763_s19, 0 }
  0x15   : > { %p35_p3 = scmp.ge.s32.totalorder %s1025_s23, 2  ;;  %p57_p4 = scmp.ne.s32.totalorder %s739_s13, %s735_s12 }
  0x16   : > { %p852_p5 = por %p52_p2, %p51_p1  ;;  %p58_p6 = scmp.eq.s32.totalorder %s429_s20, 0 }
  0x17   : > { %s1027_s23 = smov (%p35_p3, %s1025_s23), 0  ;;  %s100_s29 = sadd.s32 1, %s731_s11 }
  0x18   : > { %1002 = sst [smem:[#allocation16_spill]] %s1027_s23  ;;  %p858_p7 = por %p58_p6, %p57_p4 }
  0x19   : > { %s432_s30 = sshll.u32 %s1027_s23, 1  ;;  %s97_s3 = ssub.s32 %s759_s18, %s1027_s23 }
  0x1a   : > { %s40_s4 = sadd.s32 %s432_s30, %s1023_s22  ;;  %p98_p8 = scmp.eq.s32.totalorder %s97_s3, 0 }
  0x1b   : > { %s41_s5 = ssub.s32 %s842_s25, %s40_s4  ;;  %p110_p9 = scmp.ne.s32.totalorder %s731_s11, %s727_s10 }
  0x1c   : > { %p42_p10 = scmp.eq.s32.totalorder %s41_s5, 0  ;;  %p111_p11 = scmp.eq.s32.totalorder %s429_s20, 3 }
  0x1d   : > { %s871_s6 = scalar_select %p98_p8, %s731_s11, %s100_s29  }
  0x1e   : > { %s874_s7 = scalar_select %p42_p10, %s743_s14, %s44_s26  }
  0x1f   : > { %1004 = sst [smem:[#allocation17_spill]] %s871_s6  ;;  %p876_p12 = por %p111_p11, %p110_p9 }
  0x20   : > { %1005 = sst [smem:[#allocation18_spill]] %s874_s7  ;;  %p116_p13 = scmp.ne.s32.totalorder %s727_s10, %s723_s9 }
  0x21   : > { %p117_p0 = scmp.eq.s32.totalorder %s430_s21, 3  ;;  %p476_p1 = scmp.lt.s32.totalorder %s763_s19, 4 }
  0x22   : > { %s886_s12 = sand.u32 1, %s743_s14   ;;  %s455_s26 = sshll.u32 %s842_s25, 4 }
  0x23   : > { %p888_p2 = por %p117_p0, %p116_p13  ;;  %s437_s24 = sshll.u32 %s886_s12, 4 }
  0x24   : > { %s1008_s0 = sld [smem:[#allocation19_spill]]  ;;  %s141_s5 = scalar_lea.vmem [#allocation3], %s437_s24 }
  0x25   : > { %s151_s23 = sshll.u32 %s141_s5, 4  ;;  %p899_p3 = pnand %p476_p1, %p852_p5  ;;  %s152_s23 = int_to_ptr.vmem [resolvable:$true] %s151_s23 }
  0x26   : > { %p445_p4 = scmp.ge.s32.totalorder %s763_s19, 1  ;;  %p183_p6 = scmp.lt.s32.totalorder %s763_s19, 5 }
  0x27   : > { %s138_s25 = scalar_lea.sflag [#allocation4], %s886_s12  ;;  %s765_s22 = smov 128  }
  0x28   : > { %s766_s18 = smov 8   ;;  %p184_p8 = pnand %p445_p4, %p183_p6 }
  0x29   : > { %s165_s27 = scalar_lea.vmem [#allocation6], %s437_s24  ;;  %s162_s17 = scalar_lea.sflag [#allocation7], %s886_s12 }
  0x2a   : > { %s148_s3 = scalar_lea.hbm %s1008_s0, %s455_s26  ;;  %s175_s0 = sshll.u32 %s165_s27, 4  ;;  %s176_s0 = int_to_ptr.vmem [resolvable:$true] %s175_s0 }
  0x2b   : > { %s149_s4 = sshll.u32 %s148_s3, 4  ;;  %s172_s3 = scalar_lea.hbm %s989_s1, %s455_s26  ;;  %s150_s4 = int_to_ptr.hbm [resolvable:$true] %s149_s4 }
  0x2c   : > { %468 = dma.hbm_to_vmem [thread:$0]  (!%p899_p3), %s150_s4, 256, %s152_s23, %s138_s25, %s765_s22, %s765_s22, %s766_s18  }
  0x2d   : > { %s173_s5 = sshll.u32 %s172_s3, 4  ;;  %187 = sbr.rel (%p184_p8) target bundleno = 293 (0x125), region = 28  ;;  %s174_s5 = int_to_ptr.hbm [resolvable:$true] %s173_s5 }
  0x2e   : > { %471 = dma.hbm_to_vmem [thread:$0]  (!%p899_p3), %s174_s5, 256, %s176_s0, %s162_s17, %s765_s22, %s765_s22, %s766_s18  }
  0x2f   : > { %s189_s7 = sand.u32 (!%p184_p8), 1, %s739_s13  }
  0x30   : > { %s446_s14 = sshll.u32 (!%p184_p8), %s189_s7, 4  ;;  %s190_s6 = scalar_lea.sflag (!%p184_p8), [#allocation4], %s189_s7 }
  0x31   : > { %s193_s23 = scalar_lea.vmem (!%p184_p8), [#allocation3], %s446_s14 }
  0x32   : > { %710 = dma.done.wait (%p858_p7), %s190_s6, 256  }
  0x33   : > { %712 = vsyncadd (%p858_p7), %s190_s6, 4294967040  ;;  %s200_s24 = scalar_lea.sflag [#allocation7], %s189_s7  ;;  %s203_s26 = scalar_lea.vmem [#allocation6], %s446_s14 }
  0x34   : > { %714 = dma.done.wait (%p858_p7), %s200_s24, 256  }
  0x35   : > { %716 = vsyncadd (%p858_p7), %s200_s24, 4294967040  ;;  %s227_s0 = sand.u32 1, %s727_s10   ;;  %p449_p5 = scmp.ne.s32.totalorder %s747_s15, 0 }
  0x36   : > { %s926_s17 = sshll.u32 %s227_s0, 3 }
  0x37   : > { %s229_s18 = scalar_lea.vmem [#allocation8], %s926_s17  ;;  %239 = sbr.rel (%p449_p5) target bundleno = 63 (0x3f), region = 40 }
  0x3c   : > { %v767_v0 = vmov 0.0  }
  0x3d   : > { %240 = vst [vmem:[#allocation2] sm:$0xff] %v767_v0 }
  0x3e   : > { %241 = vst [vmem:[#allocation2 + $0x8] sm:$0xff] %v767_v0 }
  0x3f PF: > { %v242_v1 = vld [vmem:[%s193_s23] sm:$0xff]  ;;  %v243_v6 = vld [vmem:[%s193_s23 + $0x8] sm:$0xff]  ;;  %p450_p7 = scmp.ne.s32.totalorder %s747_s15, 1 }
  0x40   : > { %v244_v2 = vld [vmem:[%s203_s26] sm:$0xff]  ;;  %v248_v4 = vsub.f32 1.0, %v242_v1  ;;  %v260_v5 = vadd.f32 1e-08, %v242_v1  ;;  %v245_v7 = vld [vmem:[%s203_s26 + $0x8] sm:$0xff]  ;;  %v249_v10 = vsub.f32 1.0, %v243_v6 }
  0x41   : > { %v246_v3 = vsub.f32 1.0, %v244_v2  ;;  %v250_v8 = vmul.f32 %v244_v2, %v242_v1  ;;  %v247_v9 = vsub.f32 1.0, %v245_v7  ;;  %v261_v11 = vadd.f32 1e-08, %v243_v6 }
  0x42   : > { %569 = vlog2.f32 %v260_v5  ;;  %v268_v13 = vadd.f32 1e-08, %v248_v4  ;;  %v251_v14 = vmul.f32 %v245_v7, %v243_v6  ;;  %v269_v16 = vadd.f32 1e-08, %v249_v10 }
  0x43   : > { %v252_v12 = vmul.f32 %v248_v4, %v246_v3  ;;  %v253_v15 = vmul.f32 %v249_v10, %v247_v9  ;;  %571 = vlog2.f32 %v261_v11 }
  0x44   : > { %573 = vlog2.f32 %v268_v13  ;;  %v278_v36 = vld [vmem:[#allocation2] sm:$0xff] }
  0x45   : > { %v254_v17 = vadd.f32 %v252_v12, %v250_v8  ;;  %575 = vlog2.f32 %v269_v16  ;;  %v255_v18 = vadd.f32 %v253_v15, %v251_v14  ;;  %v279_v39 = vld [vmem:[#allocation2 + $0x8] sm:$0xff] }
  0x47   : > { %v256_v21 = vsub.f32 1.0, %v254_v17  ;;  %v257_v24 = vsub.f32 1.0, %v255_v18 }
  0x48   : > { %v570_v19 = vpop.eup %569 }
  0x49   : > { %v572_v20 = vpop.eup %571  ;;  %v263_v22 = vmul.f32 0.6931472, %v570_v19  ;;  %v258_v31 = vmul.f32 %v256_v21, %v256_v21  ;;  %v259_v33 = vmul.f32 %v257_v24, %v257_v24 }
  0x4a   : > { %v574_v23 = vpop.eup %573  ;;  %v265_v25 = vmul.f32 0.6931472, %v572_v20 }
  0x4b   : > { %v576_v26 = vpop.eup %575  ;;  %v266_v27 = vmul.f32 %v263_v22, %v244_v2  ;;  %v271_v28 = vmul.f32 0.6931472, %v574_v23 }
  0x4c   : > { %v267_v29 = vmul.f32 %v265_v25, %v245_v7  ;;  %v273_v30 = vmul.f32 0.6931472, %v576_v26 }
  0x4d   : > { %v274_v32 = vmul.f32 %v271_v28, %v246_v3 }
  0x4e   : > { %v275_v34 = vmul.f32 %v273_v30, %v247_v9 }
  0x4f   : > { %v276_v35 = vadd.f32 %v274_v32, %v266_v27 }
  0x50   : > { %v277_v37 = vadd.f32 %v275_v34, %v267_v29 }
  0x51   : > { %v280_v38 = vmul.f32 %v276_v35, %v258_v31 }
  0x52   : > { %v281_v40 = vmul.f32 %v277_v37, %v259_v33  ;;  %289 = sbr.rel (%p450_p7) target bundleno = 278 (0x116), region = 44 }
  0x53   : > { %v282_v41 = vadd.f32 %v280_v38, %v278_v36 }
  0x54   : > { %v283_v42 = vadd.f32 %v281_v40, %v279_v39 }
  0x55   : > { %284 = vst [vmem:[#allocation2] sm:$0xff] %v282_v41 }
  0x56   : > { %285 = vst [vmem:[#allocation2 + $0x8] sm:$0xff] %v283_v42 }
  0x5c   : > { %v290_v43 = vld [vmem:[#allocation2] sm:$0xff] }
  0x5d   : > { %v291_v44 = vld [vmem:[#allocation2 + $0x8] sm:$0xff] }
  0x5e   : > { %v292_v45 = vadd.f32 %v291_v44, %v290_v43 }
  0x60   : > { %293 = vadd.xlane.f32.xlu0 %v292_v45 }
  0xd3   : > { %v294_v46 = vpop.xlane.xlu0 %293 }
  0xd4   : > { %v295_v47 = vrot.slane %v294_v46, 4 }
  0xd6   : > { %v296_v48 = vadd.f32 %v295_v47, %v294_v46 }
  0xd8   : > { %v297_v49 = vrot.slane %v296_v48, 2 }
  0xda   : > { %v298_v50 = vadd.f32 %v297_v49, %v296_v48 }
  0xdc   : > { %v299_v51 = vrot.slane %v298_v50, 1 }
  0xde   : > { %v300_v52 = vadd.f32 %v299_v51, %v298_v50 }
  0xe0   : > { %457 = vpush %v300_v52 }
 0x111   : > { %s458_s14 = spop %457 }
 0x112   : > { %s302_s22 = smul.f32 -0.25, %s458_s14 }
 0x114   : > { %v303_v53 = vstv %s302_s22 }
 0x115   : > { %304 = vst [vmem:[%s229_s18] sm:$0xff] %v303_v53 }
 0x116 PF: > { %s452_s15 = sshll.u32 %s751_s16, 3  ;;  %s318_s12 = sshll.u32 %s229_s18, 4  ;;  %s319_s12 = int_to_ptr.vmem [resolvable:$true] %s318_s12 }
 0x117   : > { %s316_s7 = scalar_lea.hbm %s990_s2, %s452_s15  ;;  %s306_s21 = scalar_lea.sflag [#allocation5], %s227_s0 }
 0x118   : > { %s320_s4 = sshll.u32 %s316_s7, 4  ;;  %s657_s3 = scalar_lea.hbm %s990_s2, 16  ;;  %s321_s4 = int_to_ptr.hbm [resolvable:$true] %s320_s4 }
 0x119   : > { %s651_s25 = sshra.s32 %s321_s4, 4  ;;  %s652_s25 = int_to_ptr.hbm [resolvable:$true] %s651_s25 }
 0x11a   : > { %s653_s29 = scalar_lea.hbm %s652_s25, 8  ;;  %p658_p13 = scmp.lt.s32.totalorder %s652_s25, %s990_s2 }
 0x11b   : > { %p654_p9 = scmp.ne.s32.totalorder %s652_s25, %s653_s29  ;;  %p659_p0 = scmp.lt.s32.totalorder %s657_s3, %s653_s29 }
 0x11d   : > { %p655_p10 = pnand %p654_p9, %p876_p12  ;;  %p660_p1 = por %p659_p0, %p658_p13 }
 0x11f   : > { %p656_p11 = pneg %p655_p10 }
 0x121   : > { %p661_p3 = pnand %p660_p1, %p656_p11 }
 0x123   : > { %664 = shalt.err (!%p661_p3)
}
 0x124   : > { %463 = dma.vmem_to_hbm [thread:$0]  (%p876_p12), %s319_s12, 128, %s321_s4, %s306_s21  }
 0x125 PF: > { %p477_p4 = scmp.ge.s32.totalorder %s763_s19, 2  ;;  %s332_s23 = sand.u32 1, %s723_s9  }
 0x126   : > { %s333_s24 = scalar_lea.sflag [#allocation5], %s332_s23 }
 0x127   : > { %p473_p6 = pnand %p477_p4, %p888_p2 }
 0x129   : > { %p474_p8 = pneg %p473_p6 }
 0x12b   : > { %718 = dma.done.wait (%p474_p8), %s333_s24, 128  }
 0x12c   : > { %720 = vsyncadd (%p474_p8), %s333_s24, 4294967168  ;;  %s21_s19 = sadd.s32 1, %s763_s19   ;;  %s1010_s26 = sld [smem:[#allocation17_spill]] }
 0x12d   : > { %p18_p5 = scmp.ge.s32.totalorder %s21_s19, 6   ;;  %s1011_s8 = sld [smem:[#allocation12_spill]] }
 0x12e   : > { %s1012_s14 = sld [smem:[#allocation18_spill]]  ;;  %s1017_s9 = smov %s727_s10 }
 0x12f   : > { %s1013_s15 = sld [smem:[#allocation13_spill]]  ;;  %s1018_s10 = smov %s731_s11 }
 0x130   : > { %s1014_s16 = sld [smem:[#allocation14_spill]]  ;;  %s1020_s12 = smov %s739_s13 }
 0x131   : > { %s1015_s17 = sld [smem:[#allocation15_spill]]  ;;  %20 = sbr.rel (!%p18_p5) target bundleno = 13 (0xd), region = 94 }
 0x132   : > { %s1016_s18 = sld [smem:[#allocation16_spill]]  ;;  %s1019_s11 = smov %s1010_s26 }
 0x133   : > { %s1021_s13 = smov %s1011_s8 }
 0x136   :  { %339 = vsyncpa [#allocation4], 1 }
 0x137   :  { %341 = vsyncpa [#allocation4 + $0x1], 1 }
 0x138   :  { %342 = vsyncpa [#allocation7], 1 }
 0x139   :  { %344 = vsyncpa [#allocation7 + $0x1], 1 }
 0x13a   :  { %345 = vsyncpa [#allocation5], 1 }
 0x13b   :  { %347 = vsyncpa [#allocation5 + $0x1], 1 }

</bundles_post_ra>
